<compile_context>
chip_gen: v5e
topology: v5e:2x2
jax: 0.10.0
libtpu: 0.0.40
codegen_flags: <defaults>
</compile_context>

<pallas_src>
import math

import jax
import jax.numpy as jnp
from jax.experimental import pallas as pl
from jax.experimental.pallas import tpu as pltpu


def _raw_read_kernel(x_ref, o_ref):
    # Identity pass-through of the raw sensor buffer.  This is the hook where
    # a concrete sensor subclass would add real per-pixel compute.
    o_ref[...] = x_ref[...]


def _sublane_min(dtype) -> int:
    # f32 -> 8, bf16/f16 -> 16, int8/uint8/fp8 -> 32 (sub-32-bit dtypes pack
    # along sublanes).
    itemsize = jnp.dtype(dtype).itemsize
    return max(8, 32 // itemsize)


def _query_vmem_capacity() -> int:
    try:
        info = pltpu.get_tpu_info()
        cap = int(getattr(info, "vmem_capacity_bytes", 0))
        if cap > 0:
            return cap
    except Exception:
        pass
    return 64 << 20  # conservative default (v7x per-TC VMEM)


def _choose_lanes(total: int, sub_min: int, max_lanes: int) -> int:
    """Widest lane count L (multiple of 128) that exactly divides total.

    Prefers an L for which rows = total // L is also a multiple of sub_min
    (fully aligned tiling).  Returns 0 if no multiple of 128 divides total.
    """
    best_aligned, best_any = 0, 0
    cand = 128
    while cand <= max_lanes:
        if total % cand == 0:
            best_any = cand
            if (total // cand) % sub_min == 0:
                best_aligned = cand
        cand += 128
    return best_aligned if best_aligned else best_any


def _choose_row_tile(rows: int, sub_min: int, target_rows: int) -> int:
    """Row tile <= target_rows, multiple of sub_min, ideally dividing rows."""
    if rows % sub_min != 0:
        # Full-extent block (allowed by the (8,128) rule); caller guards size.
        return rows
    cap = max(sub_min, min(rows, target_rows - (target_rows % sub_min) or sub_min))
    t = cap
    best = 0
    while t >= sub_min:
        if rows % t == 0:
            best = t
            break
        t -= sub_min
    # Guard: if the best exact divisor collapsed far below the budget (rows
    # has a large prime factor), keep a big tile and accept a masked partial
    # last block instead of tiny (sub_min x lanes) blocks.
    if best == 0 or best * 4 < cap:
        return cap
    return best


def raw_sensor_read(
    x,
    output_shape=None,
    *,
    materialize: bool = False,
    min_pallas_bytes: int = 1 << 20,
    max_lanes: int = 4096,
):
    """RawSensor.read(x): return the raw buffer, viewed as output_shape.

    Default is a zero-copy reshape.  `materialize=True` routes through the
    Pallas copy kernel (the hook for per-pixel compute in subclasses).
    """
    if output_shape is None:
        output_shape = x.shape
    output_shape = tuple(output_shape)

    total = math.prod(x.shape) if x.shape else 1
    itemsize = jnp.dtype(x.dtype).itemsize
    nbytes = total * itemsize

    # Fast path: pure pass-through never needs HBM traffic; also bypass the
    # kernel for empty/scalar/small inputs where launch latency dominates.
    if (not materialize) or x.ndim == 0 or total == 0 or nbytes < min_pallas_bytes:
        return x.reshape(output_shape)

    sub_min = _sublane_min(x.dtype)
    lanes = _choose_lanes(total, sub_min, max_lanes)
    if lanes == 0:
        # TODO(synk): total not a multiple of 128 -> no lane-dense 2D view
        # without extra pad/slice HBM passes; the identity result is exact.
        return x.reshape(output_shape)

    rows = total // lanes

    vmem_cap = _query_vmem_capacity()
    # Bigger blocks on v5e/v6e (128 MiB VMEM), smaller on v7x (64 MiB VMEM).
    target_block_bytes = (6 << 20) if vmem_cap >= (96 << 20) else (3 << 20)
    target_rows = max(sub_min, target_block_bytes // (lanes * itemsize))

    if rows % sub_min != 0 and rows * lanes * itemsize > 4 * target_block_bytes:
        # Rare: cannot tile rows cleanly and a full-extent block would be too
        # large for VMEM -> identity fast path (exact).
        return x.reshape(output_shape)

    tr = _choose_row_tile(rows, sub_min, target_rows)
    steps = -(-rows // tr)
    # Ensure >= 2 grid steps so v7x can shard the "parallel" axis across both
    # TensorCores (only when rows can be split on an aligned boundary).
    if steps < 2 and rows >= 2 * sub_min and rows % sub_min == 0:
        tr = max(sub_min, ((rows // 2) // sub_min) * sub_min)
        steps = -(-rows // tr)

    x2d = x.reshape(rows, lanes)
    block_bytes = tr * lanes * itemsize
    # in + out, each double-buffered, plus headroom; capped <= half physical.
    need = 4 * block_bytes + (2 << 20)
    vmem_limit = int(min(max(need, 16 << 20), max(vmem_cap // 2, 32 << 20)))

    out2d = pl.pallas_call(
        _raw_read_kernel,
        out_shape=jax.ShapeDtypeStruct((rows, lanes), x.dtype),
        grid=(steps,),
        in_specs=[pl.BlockSpec((tr, lanes), lambda i: (i, 0))],
        out_specs=pl.BlockSpec((tr, lanes), lambda i: (i, 0)),
        compiler_params=pltpu.CompilerParams(
            dimension_semantics=("parallel",),
            vmem_limit_bytes=vmem_limit,
        ),
        cost_estimate=pl.CostEstimate(
            flops=0,
            transcendentals=0,
            bytes_accessed=2 * rows * lanes * itemsize,
        ),
    )(x2d)

    return out2d.reshape(output_shape)


class RawSensorJAX:
    """JAX/Pallas port of the RawSensor interface."""

    def __init__(self, world, output_shape, input_shape):
        self._world = world
        self._output_shape = tuple(output_shape)
        self._input_shape = tuple(input_shape)

    @property
    def output_shape(self):
        return self._output_shape

    @property
    def input_shape(self):
        return self._input_shape

    def read(self, x, *args, **kwargs):
        # Base-class raw read: zero-copy pass-through by default.
        return raw_sensor_read(x, self._output_shape)

    def __call__(self, x, *args, **kwargs):
        return self.read(x, *args, **kwargs)

    def forward(self, *args, **kwargs):
        return self.read(*args, **kwargs)

    def save_img(self, img, filename):
        # Matches torch reference semantics: (img * 255).astype(uint8),
        # intentionally unclamped (out-of-range pixels wrap, same as ref).
        # TODO(synk): no file I/O (imageio.imwrite) in this synthetic script.
        arr = jax.device_get(img)
        return (arr * 255).astype("uint8")


if __name__ == "__main__":
    key = jax.random.PRNGKey(0)
    N, C, H, W = 2, 4, 16, 16  # NCHW, small shapes
    x = jax.random.uniform(key, (N, C, H, W), dtype=jnp.float32)

    sensor = RawSensorJAX(world=None,
                          output_shape=(N, C, H, W),
                          input_shape=(N, C, H, W))

    # Default read(): zero-copy reshape fast path (largest win per review).
    y_fast = jax.block_until_ready(sensor(x))
    assert y_fast.shape == (N, C, H, W)
    assert y_fast.dtype == x.dtype
    assert bool(jnp.all(y_fast == x)), "raw read must be an exact pass-through"

    # Opt-in materialized read: exercises the Pallas copy kernel (the hook
    # where concrete subclasses would add per-pixel compute).
    y = raw_sensor_read(x, (N, C, H, W), materialize=True, min_pallas_bytes=0)
    y = jax.block_until_ready(y)
    assert y.shape == (N, C, H, W)
    assert y.dtype == x.dtype
    assert bool(jnp.all(y == x)), "Pallas raw read must be bit-exact"

    # Sub-32-bit dtype path (dtype-aware (16,128) tiling, bit-exact).
    x_bf16 = x.astype(jnp.bfloat16)
    y_bf16 = jax.block_until_ready(
        raw_sensor_read(x_bf16, materialize=True, min_pallas_bytes=0))
    assert y_bf16.dtype == jnp.bfloat16
    assert bool(jnp.all(y_bf16 == x_bf16)), "bf16 raw read must be bit-exact"

    print("KERNEL_OK")
</pallas_src>

<mosaic_0001>
module attributes {stable_mosaic.version = 11 : i64} {
  func.func @_raw_read_kernel(%arg0: i32, %arg1: memref<8x256xf32, #tpu.memory_space<vmem>>, %arg2: memref<8x256xf32, #tpu.memory_space<vmem>>) attributes {dimension_semantics = [#tpu.dimension_semantics<parallel>], iteration_bounds = array<i64: 1>, scalar_prefetch = 0 : i64, scratch_operands = 0 : i64, tpu.core_type = #tpu.core_type<tc>, window_params = [{transform_indices = @transform_0, window_bounds = array<i64: 8, 256>}, {transform_indices = @transform_1, window_bounds = array<i64: 8, 256>}]} {
    %c0 = arith.constant 0 : index
    %c0_0 = arith.constant 0 : index
    %0 = vector.load %arg1[%c0, %c0_0] : memref<8x256xf32, #tpu.memory_space<vmem>>, vector<8x256xf32>
    %c0_1 = arith.constant 0 : index
    %c0_2 = arith.constant 0 : index
    %1 = vector.load %arg2[%c0_1, %c0_2] : memref<8x256xf32, #tpu.memory_space<vmem>>, vector<8x256xf32>
    tpu.vector_store %arg2[%c0_1, %c0_2], %0 {strides = array<i32>} : memref<8x256xf32, #tpu.memory_space<vmem>>, vector<8x256xf32>,
    return
  }
  func.func @transform_0(%arg0: i32) -> (i32, i32) {
    %c0_i32 = arith.constant 0 : i32
    %c0_i32_0 = arith.constant 0 : i32
    return %arg0, %c0_i32 : i32, i32
  }
  func.func @transform_1(%arg0: i32) -> (i32, i32) {
    %c0_i32 = arith.constant 0 : i32
    %c0_i32_0 = arith.constant 0 : i32
    return %arg0, %c0_i32 : i32, i32
  }
}

</mosaic_0001>

<bundles_post_ra>
// kernel: tpu_custom_call.1
= control target key start
LH: loop header
LB: loop body
LE: loop exit
PB: predicated region body
PF: predicated region fallthrough
CT: control target
= control target key end

     0   :  { %6 = vsyncpa [#allocation3], 0  ;;  %s116_s0 = inlined_call_operand.hbm [shape: f32[8,256], index: 0, kind: input, shape index: {}]   ;;  %s117_s1 = inlined_call_operand.hbm [shape: f32[8,256], index: 1, kind: output, shape index: {}]  }
   0x1   :  { %7 = vsyncpa [#allocation4], 0  ;;  %s13_s8 = sshll.u32 %s116_s0, 4  ;;  %s98_s9 = smov [#allocation2]   ;;  %s14_s8 = int_to_ptr.hbm [resolvable:$true] %s13_s8 }
   0x2   :  { %s15_s10 = sshll.u32 %s98_s9, 4  ;;  %s16_s10 = int_to_ptr.vmem [resolvable:$true] %s15_s10 }
   0x3   :  { %18 = dma.hbm_to_vmem [thread:$0]  %s14_s8, 256, %s16_s10, [#allocation3]  }
   0x4   :  { %94 = dma.done.wait [#allocation3], 256  }
   0x5   :  { %95 = vsyncadd [#allocation3], 4294967040  ;;  %s99_s11 = smov [#allocation5]   ;;  %s34_s15 = sshll.u32 %s117_s1, 4  ;;  %v23_v0 = vld [vmem:[#allocation2] sm:$0xff]  ;;  %v24_v1 = vld [vmem:[#allocation2 + $0x8] sm:$0xff]  ;;  %s35_s15 = int_to_ptr.hbm [resolvable:$true] %s34_s15 }
   0x6   :  { %s32_s12 = sshll.u32 %s99_s11, 4  ;;  %25 = vst [vmem:[#allocation5] sm:$0xff] %v23_v0  ;;  %s33_s12 = int_to_ptr.vmem [resolvable:$true] %s32_s12 }
   0x7   :  { %26 = vst [vmem:[#allocation5 + $0x8] sm:$0xff] %v24_v1 }
   0x8   :  { %37 = dma.vmem_to_hbm [thread:$0]  %s33_s12, 256, %s35_s15, [#allocation4]  }
   0x9   :  { %96 = dma.done.wait [#allocation4], 256  }
   0xa   :  { %97 = vsyncadd [#allocation4], 4294967040 }
   0xb   :  { %42 = vsyncpa [#allocation3], 1 }
   0xc   :  { %43 = vsyncpa [#allocation4], 1 }

</bundles_post_ra>
